<compile_context>
chip_gen: v5e
topology: v5e:2x2
jax: 0.10.0
libtpu: 0.0.40
codegen_flags: <defaults>
</compile_context>

<pallas_src>
import functools

import jax
import jax.numpy as jnp
from jax.experimental import pallas as pl
from jax.experimental.pallas import tpu as pltpu


def _round_up(x, m):
    return (x + m - 1) // m * m


# ---------------------------------------------------------------------------
# Generation-aware sizing
# ---------------------------------------------------------------------------
def _tpu_budget():
    """Returns (max row-tile TM, vmem_limit_bytes) for this chip generation."""
    try:
        info = pltpu.get_tpu_info()
        cap = int(getattr(info, "vmem_capacity_bytes", 64 * 1024 * 1024))
    except Exception:  # interpret mode / unknown backend -> conservative
        cap = 64 * 1024 * 1024
    if cap >= 96 * 1024 * 1024:          # v5e / v6e: 128 MiB physical VMEM
        return 512, 96 * 1024 * 1024
    return 512, 48 * 1024 * 1024         # v7x: 64 MiB physical -> keep headroom


def _pick_tm(M, tm_max):
    """Prefer a TM that divides M so the big A stream never gets row-padded."""
    for cand in (tm_max, 256, 128, 64, 32, 16, 8):
        if cand <= tm_max and M % cand == 0:
            return cand
    return min(tm_max, _round_up(M, 8))


# ---------------------------------------------------------------------------
# Pallas kernels: out = [relu]( A @ W * scale + bias  [+ res | + As @ Ws * s + b] )
# ---------------------------------------------------------------------------
def _make_kernel(apply_relu, mode):
    if mode == "plain":
        def kernel(a_ref, w_ref, s_ref, b_ref, o_ref):
            acc = jnp.dot(a_ref[...], w_ref[...],
                          preferred_element_type=jnp.float32)
            acc = acc * s_ref[...] + b_ref[...]
            if apply_relu:
                acc = jnp.maximum(acc, 0.0)
            o_ref[...] = acc.astype(o_ref.dtype)
    elif mode == "residual":
        def kernel(a_ref, w_ref, s_ref, b_ref, r_ref, o_ref):
            acc = jnp.dot(a_ref[...], w_ref[...],
                          preferred_element_type=jnp.float32)
            acc = acc * s_ref[...] + b_ref[...] + r_ref[...].astype(jnp.float32)
            if apply_relu:
                acc = jnp.maximum(acc, 0.0)
            o_ref[...] = acc.astype(o_ref.dtype)
    else:  # "shortcut": fused 1x1-conv + BN downsample path
        def kernel(a_ref, w_ref, s_ref, b_ref,
                   as_ref, ws_ref, ss_ref, bs_ref, o_ref):
            acc = jnp.dot(a_ref[...], w_ref[...],
                          preferred_element_type=jnp.float32)
            acc = acc * s_ref[...] + b_ref[...]
            sc = jnp.dot(as_ref[...], ws_ref[...],
                         preferred_element_type=jnp.float32)
            acc = acc + sc * ss_ref[...] + bs_ref[...]
            if apply_relu:
                acc = jnp.maximum(acc, 0.0)
            o_ref[...] = acc.astype(o_ref.dtype)
    return kernel


def conv_gemm_bn(a, w, scale, bias, *, relu, residual=None, shortcut=None):
    """Fused GEMM + BN affine (+ residual | + fused 1x1-conv shortcut) (+ ReLU).

    a:        (M, K_a) bf16 im2col patches (K_a may already be zero-padded).
    w:        (K_w, Cout) with K_w <= K_a; extra rows are zero-padded.
    scale/bias: (Cout,) folded BN affine.
    residual: (M, Cout) activations added in the epilogue (bf16).
    shortcut: (a_s (M, Ks), w_s (Ks, Cout), scale_s, bias_s) — second MXU dot.

    Output is bf16, (M, Cout).  W/scale/bias stay resident in VMEM (constant
    index_map); only the A / residual / output row tiles are streamed.
    """
    M, K_a = a.shape
    K_w, Cout = w.shape
    assert K_w <= K_a

    tm_max, vmem_limit = _tpu_budget()
    TM = _pick_tm(M, tm_max)
    M_p = _round_up(M, TM)
    Cout_p = _round_up(Cout, 128)            # lane-dense stores

    a_p = a.astype(jnp.bfloat16)
    if M_p != M:
        a_p = jnp.pad(a_p, ((0, M_p - M), (0, 0)))
    w_p = jnp.pad(w, ((0, K_a - K_w), (0, Cout_p - Cout))).astype(jnp.bfloat16)
    s_p = jnp.pad(scale, (0, Cout_p - Cout)).reshape(1, Cout_p).astype(jnp.float32)
    b_p = jnp.pad(bias, (0, Cout_p - Cout)).reshape(1, Cout_p).astype(jnp.float32)

    inputs = [a_p, w_p, s_p, b_p]
    in_specs = [
        pl.BlockSpec((TM, K_a), lambda i: (i, 0)),       # A: streamed row tile
        pl.BlockSpec((K_a, Cout_p), lambda i: (0, 0)),   # W: resident (one DMA)
        pl.BlockSpec((1, Cout_p), lambda i: (0, 0)),     # scale: resident
        pl.BlockSpec((1, Cout_p), lambda i: (0, 0)),     # bias:  resident
    ]

    flops = 2 * M_p * K_a * Cout_p
    bytes_accessed = (a_p.size + w_p.size) * 2 + (s_p.size + b_p.size) * 4 \
        + M_p * Cout_p * 2

    if residual is not None:
        mode = "residual"
        r_p = jnp.pad(residual.astype(jnp.bfloat16),
                      ((0, M_p - M), (0, Cout_p - residual.shape[1])))
        inputs.append(r_p)
        in_specs.append(pl.BlockSpec((TM, Cout_p), lambda i: (i, 0)))
        bytes_accessed += r_p.size * 2
    elif shortcut is not None:
        mode = "shortcut"
        a_s, w_s, s_s, b_s = shortcut
        Ks = a_s.shape[1]
        Ks_p = _round_up(Ks, 8)
        a_s_p = jnp.pad(a_s.astype(jnp.bfloat16),
                        ((0, M_p - M), (0, Ks_p - Ks)))
        w_s_p = jnp.pad(w_s, ((0, Ks_p - Ks), (0, Cout_p - Cout))
                        ).astype(jnp.bfloat16)
        ss_p = jnp.pad(s_s, (0, Cout_p - Cout)).reshape(1, Cout_p).astype(jnp.float32)
        bs_p = jnp.pad(b_s, (0, Cout_p - Cout)).reshape(1, Cout_p).astype(jnp.float32)
        inputs += [a_s_p, w_s_p, ss_p, bs_p]
        in_specs += [
            pl.BlockSpec((TM, Ks_p), lambda i: (i, 0)),      # strided x: streamed
            pl.BlockSpec((Ks_p, Cout_p), lambda i: (0, 0)),  # ws: resident
            pl.BlockSpec((1, Cout_p), lambda i: (0, 0)),
            pl.BlockSpec((1, Cout_p), lambda i: (0, 0)),
        ]
        flops += 2 * M_p * Ks_p * Cout_p
        bytes_accessed += (a_s_p.size + w_s_p.size) * 2 + (ss_p.size + bs_p.size) * 4
    else:
        mode = "plain"

    kernel = _make_kernel(relu, mode)
    grid = (M_p // TM,)

    out = pl.pallas_call(
        kernel,
        out_shape=jax.ShapeDtypeStruct((M_p, Cout_p), jnp.bfloat16),
        grid=grid,
        in_specs=in_specs,
        out_specs=pl.BlockSpec((TM, Cout_p), lambda i: (i, 0)),
        compiler_params=pltpu.CompilerParams(
            # Independent output row tiles -> shard across the two v7x
            # TensorCores; harmless on single-TC v5e/v6e.
            dimension_semantics=("parallel",),
            vmem_limit_bytes=vmem_limit,
        ),
        cost_estimate=pl.CostEstimate(
            flops=flops, transcendentals=0, bytes_accessed=bytes_accessed),
    )(*inputs)

    return out[:M, :Cout]


# ---------------------------------------------------------------------------
# Glue: bf16 im2col (K-padding folded in), BN folding, weight reshaping
# ---------------------------------------------------------------------------
def im2col_bf16(x, k, stride, pad, k_pad_to=128):
    """x: (N,H,W,C) -> ((N*Ho*Wo, K_pad) bf16, Ho, Wo).

    Feature order is (kh, kw, cin); K = k*k*C is zero-padded up to a multiple
    of `k_pad_to` in the same materialization pass (lane-dense A matrix).
    """
    N, H, W, C = x.shape
    x = x.astype(jnp.bfloat16)
    xp = jnp.pad(x, ((0, 0), (pad, pad), (pad, pad), (0, 0)))
    Ho = (H + 2 * pad - k) // stride + 1
    Wo = (W + 2 * pad - k) // stride + 1
    cols = []
    for kh in range(k):
        for kw in range(k):
            cols.append(xp[:, kh:kh + (Ho - 1) * stride + 1:stride,
                           kw:kw + (Wo - 1) * stride + 1:stride, :])
    K = k * k * C
    K_p = _round_up(K, k_pad_to)
    if K_p > K:
        cols.append(jnp.zeros((N, Ho, Wo, K_p - K), jnp.bfloat16))
    patches = jnp.concatenate(cols, axis=-1)          # (N, Ho, Wo, K_p)
    return patches.reshape(N * Ho * Wo, K_p), Ho, Wo


def fold_bn(bn, eps=1e-5):
    gamma, beta, mean, var = bn
    scale = gamma / jnp.sqrt(var + eps)
    bias = beta - mean * scale
    return scale, bias


def conv_weight_to_gemm(w_oihw):
    """(Cout, Cin, KH, KW) -> (KH*KW*Cin, Cout), matching im2col ordering."""
    cout, cin, kh, kw = w_oihw.shape
    return jnp.transpose(w_oihw, (2, 3, 1, 0)).reshape(kh * kw * cin, cout)


# ---------------------------------------------------------------------------
# BasicBlock forward
# ---------------------------------------------------------------------------
def basic_block_forward(x_nchw, params, stride):
    x = jnp.transpose(x_nchw, (0, 2, 3, 1))                       # NHWC
    N, H, W, Cin = x.shape
    planes = params["w1"].shape[0]

    # --- conv1 (3x3, stride, pad=1) + bn1 + relu --------------------------
    a1, Ho, Wo = im2col_bf16(x, 3, stride, 1)
    w1 = conv_weight_to_gemm(params["w1"])
    s1, b1 = fold_bn(params["bn1"])
    out1 = conv_gemm_bn(a1, w1, s1, b1, relu=True)                # (M, planes) bf16
    out1_nhwc = out1.reshape(N, Ho, Wo, planes)

    # --- conv2 (3x3, stride 1, pad=1) + bn2 + shortcut + relu -------------
    a2, _, _ = im2col_bf16(out1_nhwc, 3, 1, 1)
    w2 = conv_weight_to_gemm(params["w2"])
    s2, b2 = fold_bn(params["bn2"])

    if stride != 1 or Cin != planes:
        # Downsample path: 1x1 stride-s conv + BN fused into the conv2 kernel.
        # (The strided view matches conv1's 3x3/pad=1/stride-s output size for
        #  standard ResNet shapes.)
        a_s = x.astype(jnp.bfloat16)[:, ::stride, ::stride, :].reshape(-1, Cin)
        ws = conv_weight_to_gemm(params["ws"])
        ss, bs = fold_bn(params["bns"])
        out = conv_gemm_bn(a2, w2, s2, b2, relu=True,
                           shortcut=(a_s, ws, ss, bs))
    else:
        res = x.astype(jnp.bfloat16).reshape(-1, Cin)             # Cin == planes
        out = conv_gemm_bn(a2, w2, s2, b2, relu=True, residual=res)

    out = out.reshape(N, Ho, Wo, planes)
    return jnp.transpose(out, (0, 3, 1, 2)).astype(jnp.float32)   # back to NCHW


# ---------------------------------------------------------------------------
# Reference in plain JAX (for correctness check)
# ---------------------------------------------------------------------------
def _conv_nchw(x, w, stride, pad):
    return jax.lax.conv_general_dilated(
        x, w, window_strides=(stride, stride),
        padding=((pad, pad), (pad, pad)),
        dimension_numbers=("NCHW", "OIHW", "NCHW"))


def reference_forward(x, params, stride, eps=1e-5):
    def bn(y, p):
        g, b, m, v = p
        g = g.reshape(1, -1, 1, 1); b = b.reshape(1, -1, 1, 1)
        m = m.reshape(1, -1, 1, 1); v = v.reshape(1, -1, 1, 1)
        return (y - m) / jnp.sqrt(v + eps) * g + b

    out = jax.nn.relu(bn(_conv_nchw(x, params["w1"], stride, 1), params["bn1"]))
    out = bn(_conv_nchw(out, params["w2"], 1, 1), params["bn2"])
    if stride != 1 or x.shape[1] != params["w1"].shape[0]:
        sc = bn(_conv_nchw(x, params["ws"], stride, 0), params["bns"])
    else:
        sc = x
    return jax.nn.relu(out + sc)


# ---------------------------------------------------------------------------
# Param init + main
# ---------------------------------------------------------------------------
def init_params(key, in_planes, planes, stride):
    ks = jax.random.split(key, 12)

    def bn_params(k0, k1, c):
        gamma = 0.5 + jax.random.uniform(k0, (c,), jnp.float32)
        beta = 0.1 * jax.random.normal(k1, (c,), jnp.float32)
        mean = 0.05 * jax.random.normal(jax.random.fold_in(k0, 7), (c,), jnp.float32)
        var = 0.5 + jax.random.uniform(jax.random.fold_in(k1, 7), (c,), jnp.float32)
        return (gamma, beta, mean, var)

    params = {
        "w1": 0.1 * jax.random.normal(ks[0], (planes, in_planes, 3, 3), jnp.float32),
        "bn1": bn_params(ks[1], ks[2], planes),
        "w2": 0.1 * jax.random.normal(ks[3], (planes, planes, 3, 3), jnp.float32),
        "bn2": bn_params(ks[4], ks[5], planes),
    }
    if stride != 1 or in_planes != planes:
        params["ws"] = 0.1 * jax.random.normal(ks[6], (planes, in_planes, 1, 1), jnp.float32)
        params["bns"] = bn_params(ks[7], ks[8], planes)
    return params


if __name__ == "__main__":
    key = jax.random.PRNGKey(0)
    k1, k2, k3, k4 = jax.random.split(key, 4)

    # Test 1: downsample block (stride 2) — exercises the fused 1x1-conv+BN
    # shortcut path inside the conv2 kernel.
    N, in_planes, H, W = 2, 4, 16, 16
    planes, stride = 8, 2
    x = jax.random.normal(k1, (N, in_planes, H, W), jnp.float32)
    params = init_params(k2, in_planes, planes, stride)
    fwd = jax.jit(functools.partial(basic_block_forward, stride=stride))
    out = jax.block_until_ready(fwd(x, params))
    ref = jax.block_until_ready(reference_forward(x, params, stride))
    assert out.shape == ref.shape == (N, planes, H // 2, W // 2)
    # bf16 MXU inputs + bf16 intermediates vs f32 reference -> loose tolerance.
    assert jnp.allclose(out, ref, rtol=6e-2, atol=6e-2), (
        float(jnp.max(jnp.abs(out - ref))))

    # Test 2: identity-shortcut block with M = 1024 rows -> multi-row-tile grid
    # (exercises i > 0 index_maps and megacore sharding on v7x).
    N2, planes2, H2, W2 = 4, 8, 16, 16
    x2 = jax.random.normal(k3, (N2, planes2, H2, W2), jnp.float32)
    params2 = init_params(k4, planes2, planes2, 1)
    fwd2 = jax.jit(functools.partial(basic_block_forward, stride=1))
    out2 = jax.block_until_ready(fwd2(x2, params2))
    ref2 = jax.block_until_ready(reference_forward(x2, params2, 1))
    assert out2.shape == ref2.shape == (N2, planes2, H2, W2)
    assert jnp.allclose(out2, ref2, rtol=6e-2, atol=6e-2), (
        float(jnp.max(jnp.abs(out2 - ref2))))

    print("KERNEL_OK")
</pallas_src>

<mosaic_0001>
module attributes {stable_mosaic.version = 11 : i64} {
  func.func @kernel(%arg0: i32, %arg1: memref<128x128xbf16, #tpu.memory_space<vmem>>, %arg2: memref<128x128xbf16, #tpu.memory_space<vmem>>, %arg3: memref<1x128xf32, #tpu.memory_space<vmem>>, %arg4: memref<1x128xf32, #tpu.memory_space<vmem>>, %arg5: memref<128x128xbf16, #tpu.memory_space<vmem>>) attributes {dimension_semantics = [#tpu.dimension_semantics<parallel>], iteration_bounds = array<i64: 1>, scalar_prefetch = 0 : i64, scratch_operands = 0 : i64, tpu.core_type = #tpu.core_type<tc>, window_params = [{transform_indices = @transform_0, window_bounds = array<i64: 128, 128>}, {pipeline_mode = #tpu.pipeline_mode<synchronous>, transform_indices = @transform_1, window_bounds = array<i64: 128, 128>}, {pipeline_mode = #tpu.pipeline_mode<synchronous>, transform_indices = @transform_2, window_bounds = array<i64: 1, 128>}, {pipeline_mode = #tpu.pipeline_mode<synchronous>, transform_indices = @transform_3, window_bounds = array<i64: 1, 128>}, {transform_indices = @transform_4, window_bounds = array<i64: 128, 128>}]} {
    %c0 = arith.constant 0 : index
    %c0_0 = arith.constant 0 : index
    %0 = vector.load %arg1[%c0, %c0_0] : memref<128x128xbf16, #tpu.memory_space<vmem>>, vector<128x128xbf16>
    %c0_1 = arith.constant 0 : index
    %c0_2 = arith.constant 0 : index
    %1 = vector.load %arg2[%c0_1, %c0_2] : memref<128x128xbf16, #tpu.memory_space<vmem>>, vector<128x128xbf16>
    %cst = arith.constant dense<0.000000e+00> : vector<128x128xf32>
    %2 = tpu.matmul %0, %1, %cst {dimension_numbers = #tpu.dot_dimension_numbers<[1], [0], [0], [1], [0, 0, 1, 1], [], []>} : vector<128x128xbf16>, vector<128x128xbf16>, vector<128x128xf32> -> vector<128x128xf32>
    %c0_3 = arith.constant 0 : index
    %c0_4 = arith.constant 0 : index
    %3 = vector.load %arg3[%c0_3, %c0_4] : memref<1x128xf32, #tpu.memory_space<vmem>>, vector<1x128xf32>
    %4 = vector.broadcast %3 : vector<1x128xf32> to vector<128x128xf32>
    %5 = arith.mulf %2, %4 : vector<128x128xf32>
    %c0_5 = arith.constant 0 : index
    %c0_6 = arith.constant 0 : index
    %6 = vector.load %arg4[%c0_5, %c0_6] : memref<1x128xf32, #tpu.memory_space<vmem>>, vector<1x128xf32>
    %7 = vector.broadcast %6 : vector<1x128xf32> to vector<128x128xf32>
    %8 = arith.addf %5, %7 : vector<128x128xf32>
    %cst_7 = arith.constant 0.000000e+00 : f32
    %9 = vector.broadcast %cst_7 : f32 to vector<128x128xf32>
    %10 = arith.maximumf %8, %9 : vector<128x128xf32>
    %11 = arith.truncf %10 : vector<128x128xf32> to vector<128x128xbf16>
    %c0_8 = arith.constant 0 : index
    %c0_9 = arith.constant 0 : index
    %12 = vector.load %arg5[%c0_8, %c0_9] : memref<128x128xbf16, #tpu.memory_space<vmem>>, vector<128x128xbf16>
    tpu.vector_store %arg5[%c0_8, %c0_9], %11 {strides = array<i32>} : memref<128x128xbf16, #tpu.memory_space<vmem>>, vector<128x128xbf16>,
    return
  }
  func.func @transform_0(%arg0: i32) -> (i32, i32) {
    %c0_i32 = arith.constant 0 : i32
    %c0_i32_0 = arith.constant 0 : i32
    return %arg0, %c0_i32 : i32, i32
  }
  func.func @transform_1(%arg0: i32) -> (i32, i32) {
    %c0_i32 = arith.constant 0 : i32
    %c0_i32_0 = arith.constant 0 : i32
    %c0_i32_1 = arith.constant 0 : i32
    return %c0_i32, %c0_i32_0 : i32, i32
  }
  func.func @transform_2(%arg0: i32) -> (i32, i32) {
    %c0_i32 = arith.constant 0 : i32
    %c0_i32_0 = arith.constant 0 : i32
    %c0_i32_1 = arith.constant 0 : i32
    return %c0_i32, %c0_i32_0 : i32, i32
  }
  func.func @transform_3(%arg0: i32) -> (i32, i32) {
    %c0_i32 = arith.constant 0 : i32
    %c0_i32_0 = arith.constant 0 : i32
    %c0_i32_1 = arith.constant 0 : i32
    return %c0_i32, %c0_i32_0 : i32, i32
  }
  func.func @transform_4(%arg0: i32) -> (i32, i32) {
    %c0_i32 = arith.constant 0 : i32
    %c0_i32_0 = arith.constant 0 : i32
    return %arg0, %c0_i32 : i32, i32
  }
}

module attributes {stable_mosaic.version = 11 : i64} {
  func.func @kernel(%arg0: i32, %arg1: memref<128x128xbf16, #tpu.memory_space<vmem>>, %arg2: memref<128x128xbf16, #tpu.memory_space<vmem>>, %arg3: memref<1x128xf32, #tpu.memory_space<vmem>>, %arg4: memref<1x128xf32, #tpu.memory_space<vmem>>, %arg5: memref<128x8xbf16, #tpu.memory_space<vmem>>, %arg6: memref<8x128xbf16, #tpu.memory_space<vmem>>, %arg7: memref<1x128xf32, #tpu.memory_space<vmem>>, %arg8: memref<1x128xf32, #tpu.memory_space<vmem>>, %arg9: memref<128x128xbf16, #tpu.memory_space<vmem>>) attributes {dimension_semantics = [#tpu.dimension_semantics<parallel>], iteration_bounds = array<i64: 1>, scalar_prefetch = 0 : i64, scratch_operands = 0 : i64, tpu.core_type = #tpu.core_type<tc>, window_params = [{transform_indices = @transform_0, window_bounds = array<i64: 128, 128>}, {pipeline_mode = #tpu.pipeline_mode<synchronous>, transform_indices = @transform_1, window_bounds = array<i64: 128, 128>}, {pipeline_mode = #tpu.pipeline_mode<synchronous>, transform_indices = @transform_2, window_bounds = array<i64: 1, 128>}, {pipeline_mode = #tpu.pipeline_mode<synchronous>, transform_indices = @transform_3, window_bounds = array<i64: 1, 128>}, {transform_indices = @transform_4, window_bounds = array<i64: 128, 8>}, {pipeline_mode = #tpu.pipeline_mode<synchronous>, transform_indices = @transform_5, window_bounds = array<i64: 8, 128>}, {pipeline_mode = #tpu.pipeline_mode<synchronous>, transform_indices = @transform_6, window_bounds = array<i64: 1, 128>}, {pipeline_mode = #tpu.pipeline_mode<synchronous>, transform_indices = @transform_7, window_bounds = array<i64: 1, 128>}, {transform_indices = @transform_8, window_bounds = array<i64: 128, 128>}]} {
    %c0 = arith.constant 0 : index
    %c0_0 = arith.constant 0 : index
    %0 = vector.load %arg1[%c0, %c0_0] : memref<128x128xbf16, #tpu.memory_space<vmem>>, vector<128x128xbf16>
    %c0_1 = arith.constant 0 : index
    %c0_2 = arith.constant 0 : index
    %1 = vector.load %arg2[%c0_1, %c0_2] : memref<128x128xbf16, #tpu.memory_space<vmem>>, vector<128x128xbf16>
    %cst = arith.constant dense<0.000000e+00> : vector<128x128xf32>
    %2 = tpu.matmul %0, %1, %cst {dimension_numbers = #tpu.dot_dimension_numbers<[1], [0], [0], [1], [0, 0, 1, 1], [], []>} : vector<128x128xbf16>, vector<128x128xbf16>, vector<128x128xf32> -> vector<128x128xf32>
    %c0_3 = arith.constant 0 : index
    %c0_4 = arith.constant 0 : index
    %3 = vector.load %arg3[%c0_3, %c0_4] : memref<1x128xf32, #tpu.memory_space<vmem>>, vector<1x128xf32>
    %4 = vector.broadcast %3 : vector<1x128xf32> to vector<128x128xf32>
    %5 = arith.mulf %2, %4 : vector<128x128xf32>
    %c0_5 = arith.constant 0 : index
    %c0_6 = arith.constant 0 : index
    %6 = vector.load %arg4[%c0_5, %c0_6] : memref<1x128xf32, #tpu.memory_space<vmem>>, vector<1x128xf32>
    %7 = vector.broadcast %6 : vector<1x128xf32> to vector<128x128xf32>
    %8 = arith.addf %5, %7 : vector<128x128xf32>
    %c0_7 = arith.constant 0 : index
    %c0_8 = arith.constant 0 : index
    %9 = vector.load %arg5[%c0_7, %c0_8] : memref<128x8xbf16, #tpu.memory_space<vmem>>, vector<128x8xbf16>
    %c0_9 = arith.constant 0 : index
    %c0_10 = arith.constant 0 : index
    %10 = vector.load %arg6[%c0_9, %c0_10] : memref<8x128xbf16, #tpu.memory_space<vmem>>, vector<8x128xbf16>
    %cst_11 = arith.constant dense<0.000000e+00> : vector<128x128xf32>
    %11 = tpu.matmul %9, %10, %cst_11 {dimension_numbers = #tpu.dot_dimension_numbers<[1], [0], [0], [1], [0, 0, 1, 1], [], []>} : vector<128x8xbf16>, vector<8x128xbf16>, vector<128x128xf32> -> vector<128x128xf32>
    %c0_12 = arith.constant 0 : index
    %c0_13 = arith.constant 0 : index
    %12 = vector.load %arg7[%c0_12, %c0_13] : memref<1x128xf32, #tpu.memory_space<vmem>>, vector<1x128xf32>
    %13 = vector.broadcast %12 : vector<1x128xf32> to vector<128x128xf32>
    %14 = arith.mulf %11, %13 : vector<128x128xf32>
    %15 = arith.addf %8, %14 : vector<128x128xf32>
    %c0_14 = arith.constant 0 : index
    %c0_15 = arith.constant 0 : index
    %16 = vector.load %arg8[%c0_14, %c0_15] : memref<1x128xf32, #tpu.memory_space<vmem>>, vector<1x128xf32>
    %17 = vector.broadcast %16 : vector<1x128xf32> to vector<128x128xf32>
    %18 = arith.addf %15, %17 : vector<128x128xf32>
    %cst_16 = arith.constant 0.000000e+00 : f32
    %19 = vector.broadcast %cst_16 : f32 to vector<128x128xf32>
    %20 = arith.maximumf %18, %19 : vector<128x128xf32>
    %21 = arith.truncf %20 : vector<128x128xf32> to vector<128x128xbf16>
    %c0_17 = arith.constant 0 : index
    %c0_18 = arith.constant 0 : index
    %22 = vector.load %arg9[%c0_17, %c0_18] : memref<128x128xbf16, #tpu.memory_space<vmem>>, vector<128x128xbf16>
    tpu.vector_store %arg9[%c0_17, %c0_18], %21 {strides = array<i32>} : memref<128x128xbf16, #tpu.memory_space<vmem>>, vector<128x128xbf16>,
    return
  }
  func.func @transform_0(%arg0: i32) -> (i32, i32) {
    %c0_i32 = arith.constant 0 : i32
    %c0_i32_0 = arith.constant 0 : i32
    return %arg0, %c0_i32 : i32, i32
  }
  func.func @transform_1(%arg0: i32) -> (i32, i32) {
    %c0_i32 = arith.constant 0 : i32
    %c0_i32_0 = arith.constant 0 : i32
    %c0_i32_1 = arith.constant 0 : i32
    return %c0_i32, %c0_i32_0 : i32, i32
  }
  func.func @transform_2(%arg0: i32) -> (i32, i32) {
    %c0_i32 = arith.constant 0 : i32
    %c0_i32_0 = arith.constant 0 : i32
    %c0_i32_1 = arith.constant 0 : i32
    return %c0_i32, %c0_i32_0 : i32, i32
  }
  func.func @transform_3(%arg0: i32) -> (i32, i32) {
    %c0_i32 = arith.constant 0 : i32
    %c0_i32_0 = arith.constant 0 : i32
    %c0_i32_1 = arith.constant 0 : i32
    return %c0_i32, %c0_i32_0 : i32, i32
  }
  func.func @transform_4(%arg0: i32) -> (i32, i32) {
    %c0_i32 = arith.constant 0 : i32
    %c0_i32_0 = arith.constant 0 : i32
    return %arg0, %c0_i32 : i32, i32
  }
  func.func @transform_5(%arg0: i32) -> (i32, i32) {
    %c0_i32 = arith.constant 0 : i32
    %c0_i32_0 = arith.constant 0 : i32
    %c0_i32_1 = arith.constant 0 : i32
    return %c0_i32, %c0_i32_0 : i32, i32
  }
  func.func @transform_6(%arg0: i32) -> (i32, i32) {
    %c0_i32 = arith.constant 0 : i32
    %c0_i32_0 = arith.constant 0 : i32
    %c0_i32_1 = arith.constant 0 : i32
    return %c0_i32, %c0_i32_0 : i32, i32
  }
  func.func @transform_7(%arg0: i32) -> (i32, i32) {
    %c0_i32 = arith.constant 0 : i32
    %c0_i32_0 = arith.constant 0 : i32
    %c0_i32_1 = arith.constant 0 : i32
    return %c0_i32, %c0_i32_0 : i32, i32
  }
  func.func @transform_8(%arg0: i32) -> (i32, i32) {
    %c0_i32 = arith.constant 0 : i32
    %c0_i32_0 = arith.constant 0 : i32
    return %arg0, %c0_i32 : i32, i32
  }
}

</mosaic_0001>

<bundles_post_ra>
// kernel: basic_block_forward.2
= control target key start
LH: loop header
LB: loop body
LE: loop exit
PB: predicated region body
PF: predicated region fallthrough
CT: control target
= control target key end

     0   :  { %s578_s1 = inlined_call_operand.vmem [shape: bf16[128,128], index: 1, kind: input, shape index: {}]   ;;  %s579_s2 = inlined_call_operand.vmem [shape: f32[1,128], index: 2, kind: input, shape index: {}]   ;;  %s580_s3 = inlined_call_operand.vmem [shape: f32[1,128], index: 3, kind: input, shape index: {}]   ;;  %s581_s0 = inlined_call_operand.vmem [shape: bf16[128,128], index: 0, kind: input, shape index: {}]   ;;  %s582_s4 = inlined_call_operand.vmem [shape: bf16[128,128], index: 4, kind: output, shape index: {}]  }
   0x1   :  { %v365_v0 = vld [vmem:[%s578_s1 + $0x38] sm:$0xff]  ;;  %v364_v1 = vld [vmem:[%s578_s1 + $0x30] sm:$0xff]  ;;  %v363_v2 = vld [vmem:[%s578_s1 + $0x28] sm:$0xff] }
   0x2   :  { %145 = vmatpush.bf16.msra.mxu0 %v365_v0  ;;  %413 = vmatpush.bf16.msra.mxu1 %v365_v0  ;;  %v362_v3 = vld [vmem:[%s578_s1 + $0x20] sm:$0xff]  ;;  %v361_v4 = vld [vmem:[%s578_s1 + $0x18] sm:$0xff]  ;;  %v360_v5 = vld [vmem:[%s578_s1 + $0x10] sm:$0xff] }
   0x3   :  { %414 = vmatpush.bf16.msra.mxu2 %v365_v0  ;;  %415 = vmatpush.bf16.msra.mxu3 %v365_v0  ;;  %v359_v6 = vld [vmem:[%s578_s1 + $0x8] sm:$0xff]  ;;  %v358_v7 = vld [vmem:[%s578_s1] sm:$0xff]  ;;  %v352_v9 = vld [vmem:[%s581_s0 + $0x10] sm:$0xff] }
   0x4   :  { %v350_v8 = vld [vmem:[%s581_s0] sm:$0xff]  ;;  %v356_v11 = vld [vmem:[%s581_s0 + $0x30] sm:$0xff]  ;;  %v351_v12 = vld [vmem:[%s581_s0 + $0x8] sm:$0xff] }
   0x5   :  { %v354_v10 = vld [vmem:[%s581_s0 + $0x20] sm:$0xff]  ;;  %v353_v13 = vld [vmem:[%s581_s0 + $0x18] sm:$0xff]  ;;  %v355_v14 = vld [vmem:[%s581_s0 + $0x28] sm:$0xff] }
   0x6   :  { %146 = vmatpush.bf16.msra.mxu0 %v364_v1  ;;  %416 = vmatpush.bf16.msra.mxu1 %v364_v1  ;;  %v357_v15 = vld [vmem:[%s581_s0 + $0x38] sm:$0xff]  ;;  %v515_v18 = vld [vmem:[%s579_s2] ss:$0 sm:$0xff] }
   0x7   :  { %417 = vmatpush.bf16.msra.mxu2 %v364_v1  ;;  %418 = vmatpush.bf16.msra.mxu3 %v364_v1  ;;  %v521_v20 = vld [vmem:[%s580_s3] ss:$0 sm:$0xff] }
   0xa   :  { %147 = vmatpush.bf16.msra.mxu0 %v363_v2  ;;  %419 = vmatpush.bf16.msra.mxu1 %v363_v2 }
   0xb   :  { %420 = vmatpush.bf16.msra.mxu2 %v363_v2  ;;  %421 = vmatpush.bf16.msra.mxu3 %v363_v2 }
   0xe   :  { %148 = vmatpush.bf16.msra.mxu0 %v362_v3  ;;  %422 = vmatpush.bf16.msra.mxu1 %v362_v3 }
   0xf   :  { %423 = vmatpush.bf16.msra.mxu2 %v362_v3  ;;  %424 = vmatpush.bf16.msra.mxu3 %v362_v3 }
  0x12   :  { %149 = vmatpush.bf16.msra.mxu0 %v361_v4  ;;  %425 = vmatpush.bf16.msra.mxu1 %v361_v4 }
  0x13   :  { %426 = vmatpush.bf16.msra.mxu2 %v361_v4  ;;  %427 = vmatpush.bf16.msra.mxu3 %v361_v4 }
  0x16   :  { %150 = vmatpush.bf16.msra.mxu0 %v360_v5  ;;  %428 = vmatpush.bf16.msra.mxu1 %v360_v5 }
  0x17   :  { %429 = vmatpush.bf16.msra.mxu2 %v360_v5  ;;  %430 = vmatpush.bf16.msra.mxu3 %v360_v5 }
  0x1a   :  { %151 = vmatpush.bf16.msra.mxu0 %v359_v6  ;;  %431 = vmatpush.bf16.msra.mxu1 %v359_v6 }
  0x1b   :  { %432 = vmatpush.bf16.msra.mxu2 %v359_v6  ;;  %433 = vmatpush.bf16.msra.mxu3 %v359_v6 }
  0x1e   :  { %152 = vmatpush.bf16.msra.mxu0 %v358_v7  ;;  %434 = vmatpush.bf16.msra.mxu1 %v358_v7 }
  0x1f   :  { %435 = vmatpush.bf16.msra.mxu2 %v358_v7  ;;  %436 = vmatpush.bf16.msra.mxu3 %v358_v7 }
  0x21   :  { %153 = vmatmul.bf16.vlgmr.msra.gmra.mxu0 %v350_v8  ;;  %163 = vmatmul.bf16.vlgmr.msra.gmra.mxu1 %v352_v9 }
  0x22   :  { %173 = vmatmul.bf16.vlgmr.msra.gmra.mxu2 %v354_v10  ;;  %183 = vmatmul.bf16.vlgmr.msra.gmra.mxu3 %v356_v11 }
  0x31   :  { %158 = vmatmul.bf16.gmra.mxu0 %v351_v12  ;;  %168 = vmatmul.bf16.gmra.mxu1 %v353_v13 }
  0x32   :  { %178 = vmatmul.bf16.gmra.mxu2 %v355_v14  ;;  %188 = vmatmul.bf16.gmra.mxu3 %v357_v15 }
  0x9e   :  { %v154_v16 = vpop.f32.mrf.mxu0  ;;  %v164_v17 = vpop.f32.mrf.mxu1 }
  0x9f   :  { %v198_v19 = vmul.f32 %v515_v18, %v154_v16  ;;  %v202_v21 = vmul.f32 %v515_v18, %v164_v17 }
  0xa1   :  { %v218_v26 = vadd.f32 %v521_v20, %v198_v19  ;;  %v222_v27 = vadd.f32 %v521_v20, %v202_v21 }
  0xa3   :  { %v234_v34 = vmax.f32 %v218_v26, 0.0  ;;  %v238_v35 = vmax.f32 %v222_v27, 0.0 }
  0xa5   :  { %v174_v22 = vpop.f32.mrf.mxu2  ;;  %v184_v23 = vpop.f32.mrf.mxu3 }
  0xa6   :  { %v156_v24 = vpop.f32.mrf.mxu0  ;;  %v166_v25 = vpop.f32.mrf.mxu1  ;;  %v206_v32 = vmul.f32 %v515_v18, %v174_v22  ;;  %v210_v33 = vmul.f32 %v515_v18, %v184_v23 }
  0xa7   :  { %v199_v28 = vmul.f32 %v515_v18, %v156_v24  ;;  %v203_v29 = vmul.f32 %v515_v18, %v166_v25 }
  0xa8   :  { %v226_v42 = vadd.f32 %v521_v20, %v206_v32  ;;  %v230_v43 = vadd.f32 %v521_v20, %v210_v33 }
  0xa9   :  { %v219_v30 = vadd.f32 %v521_v20, %v199_v28  ;;  %v223_v31 = vadd.f32 %v521_v20, %v203_v29 }
  0xaa   :  { %v242_v50 = vmax.f32 %v226_v42, 0.0  ;;  %v246_v51 = vmax.f32 %v230_v43, 0.0 }
  0xab   :  { %v235_v36 = vmax.f32 %v219_v30, 0.0  ;;  %v239_v37 = vmax.f32 %v223_v31, 0.0 }
  0xad   :  { %v369_v38 = vpack.c.bf16 %v235_v36, %v234_v34  ;;  %v379_v39 = vpack.c.bf16 %v239_v37, %v238_v35  ;;  %v176_v40 = vpop.f32.mrf.mxu2  ;;  %v186_v41 = vpop.f32.mrf.mxu3 }
  0xae   :  { %v207_v44 = vmul.f32 %v515_v18, %v176_v40  ;;  %v211_v45 = vmul.f32 %v515_v18, %v186_v41  ;;  %v159_v46 = vpop.f32.mrf.mxu0  ;;  %v169_v47 = vpop.f32.mrf.mxu1 }
  0xaf   :  { %370 = vst [vmem:[%s582_s4] sm:$0xff] %v369_v38   ;;  %v200_v54 = vmul.f32 %v515_v18, %v159_v46  ;;  %v204_v55 = vmul.f32 %v515_v18, %v169_v47 }
  0xb0   :  { %407 = vst [vmem:[%s582_s4 + $0x10] sm:$0xff] %v379_v39   ;;  %v227_v48 = vadd.f32 %v521_v20, %v207_v44  ;;  %v231_v49 = vadd.f32 %v521_v20, %v211_v45 }
  0xb1   :  { %v220_v62 = vadd.f32 %v521_v20, %v200_v54  ;;  %v224_v63 = vadd.f32 %v521_v20, %v204_v55 }
  0xb2   :  { %v243_v52 = vmax.f32 %v227_v48, 0.0  ;;  %v247_v53 = vmax.f32 %v231_v49, 0.0 }
  0xb3   :  { %v236_v6 = vmax.f32 %v220_v62, 0.0  ;;  %v240_v7 = vmax.f32 %v224_v63, 0.0 }
  0xb4   :  { %v389_v56 = vpack.c.bf16 %v243_v52, %v242_v50  ;;  %v399_v57 = vpack.c.bf16 %v247_v53, %v246_v51 }
  0xb5   :  { %v179_v58 = vpop.f32.mrf.mxu2  ;;  %v189_v59 = vpop.f32.mrf.mxu3 }
  0xb6   :  { %409 = vst [vmem:[%s582_s4 + $0x20] sm:$0xff] %v389_v56   ;;  %v161_v60 = vpop.f32.mrf.mxu0  ;;  %v171_v61 = vpop.f32.mrf.mxu1  ;;  %v208_v4 = vmul.f32 %v515_v18, %v179_v58  ;;  %v212_v5 = vmul.f32 %v515_v18, %v189_v59 }
  0xb7   :  { %411 = vst [vmem:[%s582_s4 + $0x30] sm:$0xff] %v399_v57   ;;  %v201_v0 = vmul.f32 %v515_v18, %v161_v60  ;;  %v205_v1 = vmul.f32 %v515_v18, %v171_v61 }
  0xb8   :  { %v228_v14 = vadd.f32 %v521_v20, %v208_v4  ;;  %v232_v15 = vadd.f32 %v521_v20, %v212_v5 }
  0xb9   :  { %v221_v2 = vadd.f32 %v521_v20, %v201_v0  ;;  %v225_v3 = vadd.f32 %v521_v20, %v205_v1 }
  0xba   :  { %v244_v22 = vmax.f32 %v228_v14, 0.0  ;;  %v248_v23 = vmax.f32 %v232_v15, 0.0 }
  0xbb   :  { %v237_v8 = vmax.f32 %v221_v2, 0.0  ;;  %v241_v9 = vmax.f32 %v225_v3, 0.0 }
  0xbd   :  { %v374_v10 = vpack.c.bf16 %v237_v8, %v236_v6  ;;  %v384_v11 = vpack.c.bf16 %v241_v9, %v240_v7  ;;  %v181_v12 = vpop.f32.mrf.mxu2  ;;  %v191_v13 = vpop.f32.mrf.mxu3 }
  0xbe   :  { %v209_v16 = vmul.f32 %v515_v18, %v181_v12  ;;  %v213_v17 = vmul.f32 %v515_v18, %v191_v13 }
  0xbf   :  { %406 = vst [vmem:[%s582_s4 + $0x8] sm:$0xff] %v374_v10  }
  0xc0   :  { %408 = vst [vmem:[%s582_s4 + $0x18] sm:$0xff] %v384_v11   ;;  %v229_v19 = vadd.f32 %v521_v20, %v209_v16  ;;  %v233_v21 = vadd.f32 %v521_v20, %v213_v17 }
  0xc2   :  { %v245_v24 = vmax.f32 %v229_v19, 0.0  ;;  %v249_v25 = vmax.f32 %v233_v21, 0.0 }
  0xc4   :  { %v394_v26 = vpack.c.bf16 %v245_v24, %v244_v22  ;;  %v404_v27 = vpack.c.bf16 %v249_v25, %v248_v23 }
  0xc6   :  { %410 = vst [vmem:[%s582_s4 + $0x28] sm:$0xff] %v394_v26  }
  0xc7   :  { %412 = vst [vmem:[%s582_s4 + $0x38] sm:$0xff] %v404_v27  }

// kernel: basic_block_forward.3
= control target key start
LH: loop header
LB: loop body
LE: loop exit
PB: predicated region body
PF: predicated region fallthrough
CT: control target
= control target key end

     0   :  { %vm329_vm0 = vcmask 1043456   ;;  %vm304_vm1 = vcmask 64512   ;;  %s920_s5 = inlined_call_operand.vmem [shape: bf16[8,128], index: 5, kind: input, shape index: {}]   ;;  %s921_s1 = inlined_call_operand.vmem [shape: bf16[128,128], index: 1, kind: input, shape index: {}]   ;;  %s922_s4 = inlined_call_operand.vmem [shape: bf16[128,8], index: 4, kind: input, shape index: {}]   ;;  %s923_s6 = inlined_call_operand.vmem [shape: f32[1,128], index: 6, kind: input, shape index: {}]   ;;  %s924_s0 = inlined_call_operand.vmem [shape: bf16[128,128], index: 0, kind: input, shape index: {}]   ;;  %s925_s2 = inlined_call_operand.vmem [shape: f32[1,128], index: 2, kind: input, shape index: {}]   ;;  %s926_s3 = inlined_call_operand.vmem [shape: f32[1,128], index: 3, kind: input, shape index: {}]   ;;  %s927_s7 = inlined_call_operand.vmem [shape: f32[1,128], index: 7, kind: input, shape index: {}]   ;;  %s928_s8 = inlined_call_operand.vmem [shape: bf16[128,128], index: 8, kind: output, shape index: {}]  }
   0x1   :  { %v263_v0 = vld [vmem:[%s920_s5] sm:$0xf]  ;;  %v609_v1 = vld [vmem:[%s921_s1 + $0x38] sm:$0xff]  ;;  %v608_v4 = vld [vmem:[%s921_s1 + $0x30] sm:$0xff] }
   0x2   :  { %v331_v2 = vsel %vm329_vm0, %v263_v0, 0  ;;  %v610_v3 = vld [vmem:[%s922_s4] sm:$0xff]  ;;  %158 = vmatpush.bf16.msra.mxu0 %v609_v1  ;;  %665 = vmatpush.bf16.msra.mxu2 %v609_v1  ;;  %v615_v5 = vld [vmem:[%s922_s4 + $0x28] sm:$0xff]  ;;  %v605_v8 = vld [vmem:[%s921_s1 + $0x18] sm:$0xff] }
   0x3   :  { %340 = vmatpush.bf16.msra.mxu1 %v331_v2  ;;  %673 = vmatpush.bf16.msra.mxu3 %v331_v2  ;;  %v607_v6 = vld [vmem:[%s921_s1 + $0x28] sm:$0xff]  ;;  %v606_v7 = vld [vmem:[%s921_s1 + $0x20] sm:$0xff]  ;;  %v604_v10 = vld [vmem:[%s921_s1 + $0x10] sm:$0xff] }
   0x4   :  { %v611_v9 = vld [vmem:[%s922_s4 + $0x8] sm:$0xff]  ;;  %v616_v11 = vld [vmem:[%s922_s4 + $0x30] sm:$0xff]  ;;  %v602_v13 = vld [vmem:[%s921_s1] sm:$0xff] }
   0x5   :  { %v603_v12 = vld [vmem:[%s921_s1 + $0x8] sm:$0xff]  ;;  %v594_v14 = vld [vmem:[%s924_s0] sm:$0xff]  ;;  %v612_v16 = vld [vmem:[%s922_s4 + $0x10] sm:$0xff] }
   0x6   :  { %586 = vmatmul.msk.bf16.vlgmr.msra.gmra.mxu1 %vm304_vm1, %v610_v3  ;;  %159 = vmatpush.bf16.msra.mxu0 %v608_v4  ;;  %v598_v15 = vld [vmem:[%s924_s0 + $0x20] sm:$0xff]  ;;  %v617_v17 = vld [vmem:[%s922_s4 + $0x38] sm:$0xff]  ;;  %v595_v18 = vld [vmem:[%s924_s0 + $0x8] sm:$0xff] }
   0x7   :  { %666 = vmatpush.bf16.msra.mxu2 %v608_v4  ;;  %591 = vmatmul.msk.bf16.vlgmr.msra.gmra.mxu3 %vm304_vm1, %v615_v5  ;;  %v599_v19 = vld [vmem:[%s924_s0 + $0x28] sm:$0xff]  ;;  %v613_v20 = vld [vmem:[%s922_s4 + $0x18] sm:$0xff]  ;;  %v596_v21 = vld [vmem:[%s924_s0 + $0x10] sm:$0xff] }
   0x8   :  { %v600_v22 = vld [vmem:[%s924_s0 + $0x30] sm:$0xff]  ;;  %v614_v23 = vld [vmem:[%s922_s4 + $0x20] sm:$0xff]  ;;  %v597_v24 = vld [vmem:[%s924_s0 + $0x18] sm:$0xff] }
   0x9   :  { %v601_v25 = vld [vmem:[%s924_s0 + $0x38] sm:$0xff]  ;;  %v809_v30 = vld [vmem:[%s925_s2] ss:$0 sm:$0xff] }
   0xa   :  { %160 = vmatpush.bf16.msra.mxu0 %v607_v6  ;;  %v815_v33 = vld [vmem:[%s926_s3] ss:$0 sm:$0xff] }
   0xb   :  { %667 = vmatpush.bf16.msra.mxu2 %v607_v6  ;;  %v820_v34 = vld [vmem:[%s923_s6] ss:$0 sm:$0xff] }
   0xc   :  { %v827_v41 = vld [vmem:[%s927_s7] ss:$0 sm:$0xff] }
   0xe   :  { %161 = vmatpush.bf16.msra.mxu0 %v606_v7 }
   0xf   :  { %668 = vmatpush.bf16.msra.mxu2 %v606_v7 }
  0x12   :  { %162 = vmatpush.bf16.msra.mxu0 %v605_v8 }
  0x13   :  { %669 = vmatpush.bf16.msra.mxu2 %v605_v8 }
  0x16   :  { %587 = vmatmul.msk.bf16.gmra.mxu1 %vm304_vm1, %v611_v9  ;;  %163 = vmatpush.bf16.msra.mxu0 %v604_v10 }
  0x17   :  { %670 = vmatpush.bf16.msra.mxu2 %v604_v10  ;;  %592 = vmatmul.msk.bf16.gmra.mxu3 %vm304_vm1, %v616_v11 }
  0x1a   :  { %164 = vmatpush.bf16.msra.mxu0 %v603_v12 }
  0x1b   :  { %671 = vmatpush.bf16.msra.mxu2 %v603_v12 }
  0x1e   :  { %165 = vmatpush.bf16.msra.mxu0 %v602_v13 }
  0x1f   :  { %672 = vmatpush.bf16.msra.mxu2 %v602_v13 }
  0x21   :  { %166 = vmatmul.bf16.vlgmr.msra.gmra.mxu0 %v594_v14 }
  0x22   :  { %186 = vmatmul.bf16.vlgmr.msra.gmra.mxu2 %v598_v15 }
  0x26   :  { %588 = vmatmul.msk.bf16.gmra.mxu1 %vm304_vm1, %v612_v16 }
  0x27   :  { %593 = vmatmul.msk.bf16.gmra.mxu3 %vm304_vm1, %v617_v17 }
  0x31   :  { %171 = vmatmul.bf16.gmra.mxu0 %v595_v18 }
  0x32   :  { %191 = vmatmul.bf16.gmra.mxu2 %v599_v19 }
  0x36   :  { %589 = vmatmul.msk.bf16.gmra.mxu1 %vm304_vm1, %v613_v20 }
  0x41   :  { %176 = vmatmul.bf16.gmra.mxu0 %v596_v21 }
  0x42   :  { %196 = vmatmul.bf16.gmra.mxu2 %v600_v22 }
  0x46   :  { %590 = vmatmul.msk.bf16.gmra.mxu1 %vm304_vm1, %v614_v23 }
  0x51   :  { %181 = vmatmul.bf16.gmra.mxu0 %v597_v24 }
  0x52   :  { %201 = vmatmul.bf16.gmra.mxu2 %v601_v25 }
  0x83   :  { %v342_v26 = vpop.f32.mrf.mxu1 }
  0x84   :  { %v386_v37 = vmul.f32 %v820_v34, %v342_v26 }
  0x8a   :  { %v367_v48 = vpop.f32.mrf.mxu3 }
  0x8b   :  { %v344_v27 = vpop.f32.mrf.mxu1  ;;  %v396_v3 = vmul.f32 %v820_v34, %v367_v48 }
  0x8c   :  { %v387_v43 = vmul.f32 %v820_v34, %v344_v27 }
  0x92   :  { %v369_v60 = vpop.f32.mrf.mxu3 }
  0x93   :  { %v347_v28 = vpop.f32.mrf.mxu1  ;;  %v397_v17 = vmul.f32 %v820_v34, %v369_v60 }
  0x94   :  { %v388_v58 = vmul.f32 %v820_v34, %v347_v28 }
  0x9a   :  { %v372_v16 = vpop.f32.mrf.mxu3 }
  0x9b   :  { %v349_v29 = vpop.f32.mrf.mxu1 }
  0x9c   :  { %v389_v1 = vmul.f32 %v820_v34, %v349_v29 }
  0x9e   :  { %v167_v31 = vpop.f32.mrf.mxu0 }
  0x9f   :  { %v211_v32 = vmul.f32 %v809_v30, %v167_v31 }
  0xa1   :  { %v231_v36 = vadd.f32 %v815_v33, %v211_v32 }
  0xa3   :  { %v352_v35 = vpop.f32.mrf.mxu1  ;;  %v402_v40 = vadd.f32 %v386_v37, %v231_v36 }
  0xa4   :  { %v390_v26 = vmul.f32 %v820_v34, %v352_v35 }
  0xa5   :  { %v187_v38 = vpop.f32.mrf.mxu2  ;;  %v422_v46 = vadd.f32 %v827_v41, %v402_v40 }
  0xa6   :  { %v169_v39 = vpop.f32.mrf.mxu0  ;;  %v219_v23 = vmul.f32 %v809_v30, %v187_v38 }
  0xa7   :  { %v212_v42 = vmul.f32 %v809_v30, %v169_v39  ;;  %v438_v52 = vmax.f32 %v422_v46, 0.0  ;;  %v374_v46 = vpop.f32.mrf.mxu3 }
  0xa8   :  { %v239_v37 = vadd.f32 %v815_v33, %v219_v23 }
  0xa9   :  { %v232_v44 = vadd.f32 %v815_v33, %v212_v42 }
  0xab   :  { %v354_v45 = vpop.f32.mrf.mxu1  ;;  %v403_v47 = vadd.f32 %v387_v43, %v232_v44 }
  0xac   :  { %v391_v43 = vmul.f32 %v820_v34, %v354_v45 }
  0xad   :  { %v423_v49 = vadd.f32 %v827_v41, %v403_v47  ;;  %v189_v50 = vpop.f32.mrf.mxu2  ;;  %v398_v47 = vmul.f32 %v820_v34, %v372_v16 }
  0xae   :  { %v172_v51 = vpop.f32.mrf.mxu0  ;;  %v220_v38 = vmul.f32 %v809_v30, %v189_v50 }
  0xaf   :  { %v439_v53 = vmax.f32 %v423_v49, 0.0  ;;  %v213_v54 = vmul.f32 %v809_v30, %v172_v51 }
  0xb0   :  { %v240_v50 = vadd.f32 %v815_v33, %v220_v38 }
  0xb1   :  { %v621_v55 = vpack.c.bf16 %v439_v53, %v438_v52  ;;  %v233_v57 = vadd.f32 %v815_v33, %v213_v54 }
  0xb3   :  { %v835_v56 = vpop.f32.mrf.mxu1  ;;  %622 = vst [vmem:[%s928_s8] sm:$0xff] %v621_v55   ;;  %v404_v63 = vadd.f32 %v388_v58, %v233_v57 }
  0xb5   :  { %v192_v59 = vpop.f32.mrf.mxu2  ;;  %v424_v6 = vadd.f32 %v827_v41, %v404_v63 }
  0xb6   :  { %v221_v61 = vmul.f32 %v809_v30, %v192_v59  ;;  %v174_v62 = vpop.f32.mrf.mxu0 }
  0xb7   :  { %v214_v0 = vmul.f32 %v809_v30, %v174_v62  ;;  %v440_v13 = vmax.f32 %v424_v6, 0.0 }
  0xb8   :  { %v241_v4 = vadd.f32 %v815_v33, %v221_v61 }
  0xb9   :  { %v234_v2 = vadd.f32 %v815_v33, %v214_v0 }
  0xba   :  { %v412_v10 = vadd.f32 %v396_v3, %v241_v4 }
  0xbb   :  { %v848_v5 = vpop.f32.mrf.mxu1  ;;  %v405_v7 = vadd.f32 %v389_v1, %v234_v2  ;;  %v399_v1 = vmul.f32 %v820_v34, %v374_v46 }
  0xbc   :  { %v432_v20 = vadd.f32 %v827_v41, %v412_v10 }
  0xbd   :  { %v425_v8 = vadd.f32 %v827_v41, %v405_v7  ;;  %v194_v9 = vpop.f32.mrf.mxu2 }
  0xbe   :  { %v222_v11 = vmul.f32 %v809_v30, %v194_v9  ;;  %v177_v12 = vpop.f32.mrf.mxu0  ;;  %v448_v29 = vmax.f32 %v432_v20, 0.0 }
  0xbf   :  { %v441_v14 = vmax.f32 %v425_v8, 0.0  ;;  %v215_v15 = vmul.f32 %v809_v30, %v177_v12 }
  0xc0   :  { %v242_v18 = vadd.f32 %v815_v33, %v222_v11  ;;  %v377_v11 = vpop.f32.mrf.mxu3 }
  0xc1   :  { %v626_v19 = vpack.c.bf16 %v441_v14, %v440_v13  ;;  %v235_v24 = vadd.f32 %v815_v33, %v215_v15  ;;  %v392_v13 = vmul.f32 %v820_v34, %v835_v56  ;;  %v400_v56 = vmul.f32 %v820_v34, %v377_v11 }
  0xc2   :  { %v413_v21 = vadd.f32 %v397_v17, %v242_v18 }
  0xc3   :  { %v362_v22 = vpop.f32.mrf.mxu1  ;;  %658 = vst [vmem:[%s928_s8 + $0x8] sm:$0xff] %v626_v19   ;;  %v406_v39 = vadd.f32 %v390_v26, %v235_v24 }
  0xc4   :  { %v433_v25 = vadd.f32 %v827_v41, %v413_v21  ;;  %v394_v27 = vmul.f32 %v820_v34, %v362_v22  ;;  %v393_v22 = vmul.f32 %v820_v34, %v848_v5 }
  0xc5   :  { %v197_v28 = vpop.f32.mrf.mxu2  ;;  %v426_v51 = vadd.f32 %v827_v41, %v406_v39 }
  0xc6   :  { %v449_v31 = vmax.f32 %v433_v25, 0.0  ;;  %v223_v32 = vmul.f32 %v809_v30, %v197_v28  ;;  %v179_v36 = vpop.f32.mrf.mxu0  ;;  %v410_v44 = vadd.f32 %v394_v27, %v239_v37 }
  0xc7   :  { %v216_v40 = vmul.f32 %v809_v30, %v179_v36  ;;  %v442_v61 = vmax.f32 %v426_v51, 0.0 }
  0xc8   :  { %v646_v42 = vpack.c.bf16 %v449_v31, %v448_v29  ;;  %v243_v48 = vadd.f32 %v815_v33, %v223_v32  ;;  %v430_v53 = vadd.f32 %v827_v41, %v410_v44  ;;  %v379_v28 = vpop.f32.mrf.mxu3 }
  0xc9   :  { %v236_v35 = vadd.f32 %v815_v33, %v216_v40  ;;  %v401_v37 = vmul.f32 %v820_v34, %v379_v28 }
  0xca   :  { %662 = vst [vmem:[%s928_s8 + $0x28] sm:$0xff] %v646_v42   ;;  %v414_v58 = vadd.f32 %v398_v47, %v243_v48  ;;  %v446_v3 = vmax.f32 %v430_v53, 0.0 }
  0xcb   :  { %v364_v49 = vpop.f32.mrf.mxu1  ;;  %v407_v52 = vadd.f32 %v391_v43, %v236_v35 }
  0xcc   :  { %v395_v45 = vmul.f32 %v820_v34, %v364_v49  ;;  %v434_v7 = vadd.f32 %v827_v41, %v414_v58 }
  0xcd   :  { %v427_v54 = vadd.f32 %v827_v41, %v407_v52  ;;  %v199_v57 = vpop.f32.mrf.mxu2 }
  0xce   :  { %v411_v55 = vadd.f32 %v395_v45, %v240_v50  ;;  %v224_v59 = vmul.f32 %v809_v30, %v199_v57  ;;  %v182_v60 = vpop.f32.mrf.mxu0  ;;  %v450_v15 = vmax.f32 %v434_v7, 0.0 }
  0xcf   :  { %v443_v62 = vmax.f32 %v427_v54, 0.0  ;;  %v217_v0 = vmul.f32 %v809_v30, %v182_v60 }
  0xd0   :  { %v431_v63 = vadd.f32 %v827_v41, %v411_v55  ;;  %v244_v2 = vadd.f32 %v815_v33, %v224_v59 }
  0xd1   :  { %v631_v4 = vpack.c.bf16 %v443_v62, %v442_v61  ;;  %v237_v10 = vadd.f32 %v815_v33, %v217_v0 }
  0xd2   :  { %v447_v6 = vmax.f32 %v431_v63, 0.0  ;;  %v415_v8 = vadd.f32 %v399_v1, %v244_v2 }
  0xd3   :  { %659 = vst [vmem:[%s928_s8 + $0x10] sm:$0xff] %v631_v4   ;;  %v408_v19 = vadd.f32 %v392_v13, %v237_v10 }
  0xd4   :  { %v641_v9 = vpack.c.bf16 %v447_v6, %v446_v3  ;;  %v435_v12 = vadd.f32 %v827_v41, %v415_v8 }
  0xd5   :  { %v202_v14 = vpop.f32.mrf.mxu2  ;;  %v428_v25 = vadd.f32 %v827_v41, %v408_v19 }
  0xd6   :  { %661 = vst [vmem:[%s928_s8 + $0x20] sm:$0xff] %v641_v9   ;;  %v451_v16 = vmax.f32 %v435_v12, 0.0  ;;  %v225_v17 = vmul.f32 %v809_v30, %v202_v14  ;;  %v184_v18 = vpop.f32.mrf.mxu0 }
  0xd7   :  { %v218_v20 = vmul.f32 %v809_v30, %v184_v18  ;;  %v444_v32 = vmax.f32 %v428_v25, 0.0 }
  0xd8   :  { %v651_v21 = vpack.c.bf16 %v451_v16, %v450_v15  ;;  %v245_v24 = vadd.f32 %v815_v33, %v225_v17 }
  0xd9   :  { %v238_v23 = vadd.f32 %v815_v33, %v218_v20 }
  0xda   :  { %663 = vst [vmem:[%s928_s8 + $0x30] sm:$0xff] %v651_v21   ;;  %v416_v31 = vadd.f32 %v400_v56, %v245_v24 }
  0xdb   :  { %v409_v26 = vadd.f32 %v393_v22, %v238_v23 }
  0xdc   :  { %v436_v40 = vadd.f32 %v827_v41, %v416_v31 }
  0xdd   :  { %v429_v27 = vadd.f32 %v827_v41, %v409_v26  ;;  %v204_v29 = vpop.f32.mrf.mxu2 }
  0xde   :  { %v226_v5 = vmul.f32 %v809_v30, %v204_v29  ;;  %v452_v44 = vmax.f32 %v436_v40, 0.0 }
  0xdf   :  { %v445_v36 = vmax.f32 %v429_v27, 0.0 }
  0xe0   :  { %v246_v38 = vadd.f32 %v815_v33, %v226_v5 }
  0xe1   :  { %v636_v39 = vpack.c.bf16 %v445_v36, %v444_v32 }
  0xe2   :  { %v417_v42 = vadd.f32 %v401_v37, %v246_v38 }
  0xe3   :  { %660 = vst [vmem:[%s928_s8 + $0x18] sm:$0xff] %v636_v39  }
  0xe4   :  { %v437_v43 = vadd.f32 %v827_v41, %v417_v42 }
  0xe6   :  { %v453_v35 = vmax.f32 %v437_v43, 0.0 }
  0xe8   :  { %v656_v46 = vpack.c.bf16 %v453_v35, %v452_v44 }
  0xea   :  { %664 = vst [vmem:[%s928_s8 + $0x38] sm:$0xff] %v656_v46  }

</bundles_post_ra>
